<compile_context>
chip_gen: v7x
topology: tpu7x:2x2x1
jax: 0.10.0
libtpu: 0.0.40
codegen_flags: <defaults>
</compile_context>

<pallas_src>
import jax
import jax.numpy as jnp
from jax.experimental import pallas as pl
from jax.experimental.pallas import tpu as pltpu


# ~4 MiB per tile; with default double-buffering on input + (aliased) output the
# pipelined footprint is <= 4x tile = 16 MiB, well under the 32 MiB VMEM limit
# requested below (and under v7x's 64 MiB physical VMEM).
_TARGET_TILE_BYTES = 4 * 1024 * 1024
_VMEM_LIMIT_BYTES = 32 * 1024 * 1024


def _copy_kernel(x_ref, o_ref):
    # Pure lane-dense identity copy; the reshape is metadata in the wrapper.
    o_ref[...] = x_ref[...]


def _sublane_multiple(dtype):
    """Sublane packing multiple: 8 rows for 4-byte, 16 for 2-byte, 32 for 1-byte."""
    itemsize = jnp.dtype(dtype).itemsize
    return max(8, 8 * (4 // itemsize))


def _pick_lane_block(f, itemsize):
    """Largest lane-dense (multiple-of-128) block along the feature axis."""
    # Cap a single block row at 32 KiB so the batch axis can still supply rows.
    max_lanes = max(128, (32 * 1024) // itemsize)
    if f <= 128:
        return f                      # full-extent axis (satisfies the (8,128) rule)
    cand = (min(f, max_lanes) // 128) * 128
    c = cand
    while c >= 128:                   # prefer an exact divisor -> no masked remainder tile
        if f % c == 0:
            return c
        c -= 128
    return cand                       # f not 128-aligned: aligned blocks + cdiv remainder tile


def _pick_batch_block(b, block_f, itemsize, sub):
    """Largest multiple of `sub` rows whose tile stays under _TARGET_TILE_BYTES."""
    if b <= sub:
        return b                      # full-extent batch axis satisfies the (8,128) rule
    row_bytes = block_f * itemsize
    max_rows = max(sub, (_TARGET_TILE_BYTES // row_bytes) // sub * sub)
    block_b = min(max_rows, (b // sub) * sub)
    # Keep >= 2 grid steps along the parallel batch axis when the batch allows it,
    # so both v7x TensorCores contribute HBM bandwidth (no (1,1) mega-tile grid).
    if b >= 2 * sub:
        half = max(sub, (pl.cdiv(b, 2) // sub) * sub)
        block_b = min(block_b, half)
    return block_b


def unflatten(x, channel, height, width):
    """Pallas equivalent of Unflatten.forward: (B, C*H*W) -> (B, C, H, W)."""
    b, f = x.shape
    assert f == channel * height * width, "size mismatch with view target"

    itemsize = jnp.dtype(x.dtype).itemsize
    sub = _sublane_multiple(x.dtype)
    block_f = _pick_lane_block(f, itemsize)
    block_b = _pick_batch_block(b, block_f, itemsize, sub)
    grid = (pl.cdiv(b, block_b), pl.cdiv(f, block_f))

    flat_out = pl.pallas_call(
        _copy_kernel,
        out_shape=jax.ShapeDtypeStruct((b, f), x.dtype),
        grid_spec=pltpu.PrefetchScalarGridSpec(
            num_scalar_prefetch=0,
            grid=grid,
            in_specs=[pl.BlockSpec((block_b, block_f), lambda i, j: (i, j))],
            out_specs=pl.BlockSpec((block_b, block_f), lambda i, j: (i, j)),
        ),
        # Identity copy with identical index maps: donate the input HBM buffer
        # (drops the extra B*F output allocation / peak HBM footprint).
        input_output_aliases={0: 0},
        # Pure-bandwidth op: tell XLA's scheduler there is no compute to hide.
        cost_estimate=pl.CostEstimate(
            flops=0, transcendentals=0, bytes_accessed=2 * b * f * itemsize),
        compiler_params=pltpu.CompilerParams(
            dimension_semantics=("parallel", "parallel"),
            vmem_limit_bytes=_VMEM_LIMIT_BYTES,
        ),
    )(x)

    # View-style unflatten: metadata-only reshape in the wrapper (no data movement).
    return flat_out.reshape(b, channel, height, width)


if __name__ == "__main__":
    # Module config consistent with __init__(channel, height, width).
    B, C, H, W = 2, 4, 16, 16
    key = jax.random.PRNGKey(0)
    x = jax.random.normal(key, (B, C * H * W), dtype=jnp.float32)

    # Reference of torch's .view semantics, materialized before the kernel runs.
    ref = jax.block_until_ready(x.reshape(B, C, H, W))

    y = jax.block_until_ready(unflatten(x, C, H, W))

    assert y.shape == (B, C, H, W)
    assert y.dtype == x.dtype
    assert bool(jnp.array_equal(y, ref))

    print("KERNEL_OK")
</pallas_src>

<mosaic_0001>
module attributes {stable_mosaic.version = 11 : i64} {
  func.func @_copy_kernel(%arg0: i32, %arg1: i32, %arg2: memref<2x1024xf32, #tpu.memory_space<vmem>>, %arg3: memref<2x1024xf32, #tpu.memory_space<vmem>>) attributes {dimension_semantics = [#tpu.dimension_semantics<parallel>, #tpu.dimension_semantics<parallel>], iteration_bounds = array<i64: 1, 1>, scalar_prefetch = 0 : i64, scratch_operands = 0 : i64, tpu.core_type = #tpu.core_type<tc>, window_params = [{transform_indices = @transform_0, window_bounds = array<i64: 2, 1024>}, {transform_indices = @transform_1, window_bounds = array<i64: 2, 1024>}]} {
    %c0 = arith.constant 0 : index
    %c0_0 = arith.constant 0 : index
    %0 = vector.load %arg2[%c0, %c0_0] : memref<2x1024xf32, #tpu.memory_space<vmem>>, vector<2x1024xf32>
    %c0_1 = arith.constant 0 : index
    %c0_2 = arith.constant 0 : index
    %1 = vector.load %arg3[%c0_1, %c0_2] : memref<2x1024xf32, #tpu.memory_space<vmem>>, vector<2x1024xf32>
    tpu.vector_store %arg3[%c0_1, %c0_2], %0 {strides = array<i32>} : memref<2x1024xf32, #tpu.memory_space<vmem>>, vector<2x1024xf32>,
    return
  }
  func.func @transform_0(%arg0: i32, %arg1: i32) -> (i32, i32) {
    %c0_i32 = arith.constant 0 : i32
    return %arg0, %arg1 : i32, i32
  }
  func.func @transform_1(%arg0: i32, %arg1: i32) -> (i32, i32) {
    %c0_i32 = arith.constant 0 : i32
    return %arg0, %arg1 : i32, i32
  }
}

</mosaic_0001>

<bundles_post_ra>
// kernel: tpu_custom_call.1
= control target key start
LH: loop header
LB: loop body
LE: loop exit
PB: predicated region body
PF: predicated region fallthrough
CT: control target
= control target key end

     0   :  { %6 = vsyncpa [#allocation3], 0  ;;  %s126_s0 = inlined_call_operand.hbm [shape: f32[2,1024], index: 0, kind: input, shape index: {}, may-alias: {0,1}]   ;;  %s127_s1 = inlined_call_operand.hbm [shape: f32[2,1024], index: 1, kind: output, shape index: {}, may-alias: {0,1}]  }
   0x1   :  { %7 = vsyncpa [#allocation4], 0  ;;  %s90_s6 = smov [#allocation2]   ;;  %s42_s10 = scalar_lea.hbm %s126_s0, 256 }
   0x2   :  { %s14_s7 = sshll.u32 %s90_s6, 4  ;;  %p43_p0 = scmp.ne.s32.totalorder %s126_s0, %s42_s10  ;;  %s15_s7 = int_to_ptr.vmem [resolvable:$true] %s14_s7 }
   0x3   :  { %p46_p1 = scmp.lt.u32.totalorder %s42_s10, %s126_s0 }
   0x5   :  { %p48_p2 = pnand %p46_p1, %p43_p0 }
   0x7   :  { %51 = shalt.err (!%p48_p2)
}
   0x8   :  { %s52_s15 = scalar_lea.vmem %s15_s7, 256  ;;  %p57_p4 = scmp.lt.s32.totalorder %s15_s7, %s15_s7 }
   0x9   :  { %p53_p3 = scmp.ne.s32.totalorder %s15_s7, %s52_s15  ;;  %p58_p5 = scmp.lt.s32.totalorder %s52_s15, %s52_s15 }
   0xb   :  { %p59_p6 = por %p58_p5, %p57_p4 }
   0xd   :  { %p60_p7 = pnand %p59_p6, %p53_p3 }
   0xf   :  { %63 = shalt.err (!%p60_p7)
}
  0x10   :  { %17 = dma.hbm_to_vmem [thread:$0]  %s126_s0, 256, %s15_s7, [#allocation3]  }
  0x11   :  { %86 = dma.done.wait [#allocation3], 256  }
  0x12   :  { %87 = vsyncadd [#allocation3], 4294967040  ;;  %s91_s18 = smov [#allocation5]   ;;  %v21_v0 = vld [vmem:[#allocation2] sm:$0xff]  ;;  %v22_v1 = vld [vmem:[#allocation2 + $0x8] sm:$0xff] }
  0x13   :  { %s31_s19 = sshll.u32 %s91_s18, 4  ;;  %23 = vst [vmem:[#allocation5] sm:$0xff] %v21_v0  ;;  %24 = vst [vmem:[#allocation5 + $0x8] sm:$0xff] %v22_v1  ;;  %s32_s19 = int_to_ptr.vmem [resolvable:$true] %s31_s19 }
  0x14   :  { %s64_s20 = scalar_lea.vmem %s32_s19, 256  ;;  %p69_p9 = scmp.lt.s32.totalorder %s32_s19, %s32_s19 }
  0x15   :  { %p65_p8 = scmp.ne.s32.totalorder %s32_s19, %s64_s20  ;;  %p70_p10 = scmp.lt.s32.totalorder %s64_s20, %s64_s20 }
  0x17   :  { %p71_p11 = por %p70_p10, %p69_p9 }
  0x19   :  { %p72_p12 = pnand %p71_p11, %p65_p8 }
  0x1b   :  { %75 = shalt.err (!%p72_p12)
}
  0x1c   :  { %s76_s0 = scalar_lea.hbm %s127_s1, 256 }
  0x1d   :  { %p77_p13 = scmp.ne.s32.totalorder %s127_s1, %s76_s0  ;;  %p80_p0 = scmp.lt.u32.totalorder %s76_s0, %s127_s1 }
  0x1f   :  { %p82_p1 = pnand %p80_p0, %p77_p13 }
  0x21   :  { %85 = shalt.err (!%p82_p1)
}
  0x22   :  { %34 = dma.vmem_to_hbm [thread:$0]  %s32_s19, 256, %s127_s1, [#allocation4]  }
  0x23   :  { %88 = dma.done.wait [#allocation4], 256  }
  0x24   :  { %89 = vsyncadd [#allocation4], 4294967040 }
  0x25   :  { %38 = vsyncpa [#allocation3], 1 }
  0x26   :  { %39 = vsyncpa [#allocation4], 1 }

</bundles_post_ra>
